<compile_context>
chip_gen: v6e
topology: v6e:2x2x1
jax: 0.10.0
libtpu: 0.0.40
codegen_flags: <defaults>
</compile_context>

<pallas_src>
import functools

import jax
import jax.numpy as jnp
from jax.experimental import pallas as pl
from jax.experimental.pallas import tpu as pltpu

IN_DIM = 28 * 28        # 784
H1 = 512
H2 = 256
OUT = 1


def discriminator_kernel(x_ref, w1_ref, b1_ref, w2_ref, b2_ref, w3_ref, b3_ref, o_ref):
    # x_ref: (tb, 784) f32 tile. Cast once on the VPU; the two big matmuls run
    # bf16 on the MXU with f32 accumulation; bias/ReLU/sigmoid stay in f32.
    x = x_ref[...].astype(jnp.bfloat16)

    # Linear(784 -> 512) + ReLU
    h1 = jnp.dot(x, w1_ref[...], preferred_element_type=jnp.float32) + b1_ref[...]
    h1 = jnp.maximum(h1, 0.0)

    # Linear(512 -> 256) + ReLU
    h2 = jnp.dot(h1.astype(jnp.bfloat16), w2_ref[...],
                 preferred_element_type=jnp.float32) + b2_ref[...]
    h2 = jnp.maximum(h2, 0.0)

    # Linear(256 -> 1) as a lane reduction (avoids a wasted N=1 MXU issue).
    z = jnp.sum(h2 * w3_ref[...], axis=-1, keepdims=True) + b3_ref[...]   # (tb, 1)

    # Real (tb, 1) output column — tiny masked store, no redundant slab.
    o_ref[...] = jax.nn.sigmoid(z).astype(o_ref.dtype)


def _choose_tb(batch, tb_max=512):
    """Batch tile: multiple of 8, <= tb_max, and >= 2 grid steps when possible
    so dimension_semantics=("parallel",) can shard steps across v7x's 2 TCs."""
    b8 = pl.cdiv(batch, 8) * 8
    if b8 >= 2 * tb_max:
        return tb_max
    half = pl.cdiv(pl.cdiv(b8, 2), 8) * 8
    return max(8, min(tb_max, half))


@functools.partial(jax.jit, static_argnames=("tb",))
def _forward(x2d, w1, b1, w2, b2, w3_row, b3, *, tb):
    B = x2d.shape[0]
    B_pad = pl.cdiv(B, tb) * tb
    x_p = jnp.pad(x2d, ((0, B_pad - B), (0, 0)))   # fuses under jit; K unpadded

    out = pl.pallas_call(
        discriminator_kernel,
        out_shape=jax.ShapeDtypeStruct((B_pad, OUT), jnp.float32),
        grid_spec=pltpu.PrefetchScalarGridSpec(
            num_scalar_prefetch=0,
            grid=(B_pad // tb,),
            in_specs=[
                # batch tile of f32 activations (last dim == full 784 -> legal)
                pl.BlockSpec((tb, IN_DIM), lambda i: (i, 0)),
                # weights / biases: full arrays, resident across grid steps
                pl.BlockSpec((IN_DIM, H1), lambda i: (0, 0)),
                pl.BlockSpec((1, H1), lambda i: (0, 0)),
                pl.BlockSpec((H1, H2), lambda i: (0, 0)),
                pl.BlockSpec((1, H2), lambda i: (0, 0)),
                pl.BlockSpec((1, H2), lambda i: (0, 0)),
                pl.BlockSpec((1, 1), lambda i: (0, 0)),
            ],
            out_specs=pl.BlockSpec((tb, OUT), lambda i: (i, 0)),
        ),
        compiler_params=pltpu.CompilerParams(
            dimension_semantics=("parallel",),   # batch steps split across TCs on v7x
        ),
    )(x_p, w1, b1, w2, b2, w3_row, b3)

    return out[:B]   # drop batch padding (fused under jit)


def discriminator_forward(x, prepped_params, *, tb_max=512):
    """x: (B, 1, 28, 28) or (B, 784). Returns (B, 1) sigmoid scores."""
    x2d = x.reshape(-1, IN_DIM).astype(jnp.float32)
    tb = _choose_tb(x2d.shape[0], tb_max)
    return _forward(x2d, *prepped_params, tb=tb)


def prepare_params(params):
    """One-time conversion of f32 (in,out)-layout params to kernel-ready form.

    Hoisted out of the forward so per-call HBM traffic is only activations +
    already-converted weights (no per-call cast/reshape pass)."""
    w1, b1, w2, b2, w3, b3 = params
    return (
        w1.astype(jnp.bfloat16),                       # (784, 512) bf16
        b1.reshape(1, H1).astype(jnp.float32),         # (1, 512)   f32
        w2.astype(jnp.bfloat16),                       # (512, 256) bf16
        b2.reshape(1, H2).astype(jnp.float32),         # (1, 256)   f32
        w3.reshape(1, H2).astype(jnp.float32),         # (1, 256)   f32 row
        b3.reshape(1, 1).astype(jnp.float32),          # (1, 1)     f32
    )


def init_params(key):
    """Deterministic init matching nn.Linear's U(-1/sqrt(fan_in), 1/sqrt(fan_in))."""
    ks = jax.random.split(key, 6)

    def linear(kw, kb, fan_in, fan_out):
        bound = 1.0 / jnp.sqrt(fan_in)
        w = jax.random.uniform(kw, (fan_in, fan_out), jnp.float32, -bound, bound)
        b = jax.random.uniform(kb, (1, fan_out), jnp.float32, -bound, bound)
        return w, b

    w1, b1 = linear(ks[0], ks[1], IN_DIM, H1)
    w2, b2 = linear(ks[2], ks[3], H1, H2)
    w3, b3 = linear(ks[4], ks[5], H2, OUT)
    return (w1, b1, w2, b2, w3, b3)


def reference_forward(x, params):
    """Pure-JAX reference that mirrors the kernel's bf16 quantization points.

    Note: both this reference and the kernel deviate slightly from a true f32
    PyTorch forward because of the bf16 MXU inputs (f32 accumulation)."""
    w1, b1, w2, b2, w3, b3 = params
    x2d = x.reshape(-1, IN_DIM).astype(jnp.float32)
    xb = x2d.astype(jnp.bfloat16).astype(jnp.float32)
    w1b = w1.astype(jnp.bfloat16).astype(jnp.float32)
    w2b = w2.astype(jnp.bfloat16).astype(jnp.float32)
    h1 = jnp.maximum(xb @ w1b + b1, 0.0)
    h1b = h1.astype(jnp.bfloat16).astype(jnp.float32)
    h2 = jnp.maximum(h1b @ w2b + b2, 0.0)
    z = h2 @ w3 + b3
    return jax.nn.sigmoid(z)


if __name__ == "__main__":
    key = jax.random.PRNGKey(0)
    k_x, k_p = jax.random.split(key)

    B = 16  # small batch; tile picker gives tb=8, grid=(2,) -> both v7x TCs exercised
    x = jax.random.normal(k_x, (B, 1, 28, 28), jnp.float32)  # NCHW like PyTorch MNIST
    params = init_params(k_p)
    prepped = prepare_params(params)   # one-time weight prep, outside the forward

    out = discriminator_forward(x, prepped)
    out = jax.block_until_ready(out)

    ref = reference_forward(x, params)
    assert out.shape == (B, OUT), out.shape
    assert jnp.allclose(out, ref, atol=2e-3, rtol=2e-3), "mismatch vs pure-JAX reference"

    print("KERNEL_OK")
</pallas_src>

<mosaic_0001>
module attributes {stable_mosaic.version = 11 : i64} {
  func.func @discriminator_kernel(%arg0: i32, %arg1: memref<8x784xf32, #tpu.memory_space<vmem>>, %arg2: memref<784x512xbf16, #tpu.memory_space<vmem>>, %arg3: memref<1x512xf32, #tpu.memory_space<vmem>>, %arg4: memref<512x256xbf16, #tpu.memory_space<vmem>>, %arg5: memref<1x256xf32, #tpu.memory_space<vmem>>, %arg6: memref<1x256xf32, #tpu.memory_space<vmem>>, %arg7: memref<1x1xf32, #tpu.memory_space<vmem>>, %arg8: memref<8x1xf32, #tpu.memory_space<vmem>>) attributes {dimension_semantics = [#tpu.dimension_semantics<parallel>], iteration_bounds = array<i64: 2>, scalar_prefetch = 0 : i64, scratch_operands = 0 : i64, tpu.core_type = #tpu.core_type<tc>, window_params = [{transform_indices = @transform_0, window_bounds = array<i64: 8, 784>}, {pipeline_mode = #tpu.pipeline_mode<synchronous>, transform_indices = @transform_1, window_bounds = array<i64: 784, 512>}, {pipeline_mode = #tpu.pipeline_mode<synchronous>, transform_indices = @transform_2, window_bounds = array<i64: 1, 512>}, {pipeline_mode = #tpu.pipeline_mode<synchronous>, transform_indices = @transform_3, window_bounds = array<i64: 512, 256>}, {pipeline_mode = #tpu.pipeline_mode<synchronous>, transform_indices = @transform_4, window_bounds = array<i64: 1, 256>}, {pipeline_mode = #tpu.pipeline_mode<synchronous>, transform_indices = @transform_5, window_bounds = array<i64: 1, 256>}, {pipeline_mode = #tpu.pipeline_mode<synchronous>, transform_indices = @transform_6, window_bounds = array<i64: 1, 1>}, {transform_indices = @transform_7, window_bounds = array<i64: 8, 1>}]} {
    %c0 = arith.constant 0 : index
    %c0_0 = arith.constant 0 : index
    %0 = vector.load %arg1[%c0, %c0_0] : memref<8x784xf32, #tpu.memory_space<vmem>>, vector<8x784xf32>
    %1 = arith.truncf %0 : vector<8x784xf32> to vector<8x784xbf16>
    %c0_1 = arith.constant 0 : index
    %c0_2 = arith.constant 0 : index
    %2 = vector.load %arg2[%c0_1, %c0_2] : memref<784x512xbf16, #tpu.memory_space<vmem>>, vector<784x512xbf16>
    %cst = arith.constant dense<0.000000e+00> : vector<8x512xf32>
    %3 = tpu.matmul %1, %2, %cst {dimension_numbers = #tpu.dot_dimension_numbers<[1], [0], [0], [1], [0, 0, 1, 1], [], []>} : vector<8x784xbf16>, vector<784x512xbf16>, vector<8x512xf32> -> vector<8x512xf32>
    %c0_3 = arith.constant 0 : index
    %c0_4 = arith.constant 0 : index
    %4 = vector.load %arg3[%c0_3, %c0_4] : memref<1x512xf32, #tpu.memory_space<vmem>>, vector<1x512xf32>
    %5 = vector.broadcast %4 : vector<1x512xf32> to vector<8x512xf32>
    %6 = arith.addf %3, %5 : vector<8x512xf32>
    %cst_5 = arith.constant 0.000000e+00 : f32
    %7 = vector.broadcast %cst_5 : f32 to vector<8x512xf32>
    %8 = arith.maximumf %6, %7 : vector<8x512xf32>
    %9 = arith.truncf %8 : vector<8x512xf32> to vector<8x512xbf16>
    %c0_6 = arith.constant 0 : index
    %c0_7 = arith.constant 0 : index
    %10 = vector.load %arg4[%c0_6, %c0_7] : memref<512x256xbf16, #tpu.memory_space<vmem>>, vector<512x256xbf16>
    %cst_8 = arith.constant dense<0.000000e+00> : vector<8x256xf32>
    %11 = tpu.matmul %9, %10, %cst_8 {dimension_numbers = #tpu.dot_dimension_numbers<[1], [0], [0], [1], [0, 0, 1, 1], [], []>} : vector<8x512xbf16>, vector<512x256xbf16>, vector<8x256xf32> -> vector<8x256xf32>
    %c0_9 = arith.constant 0 : index
    %c0_10 = arith.constant 0 : index
    %12 = vector.load %arg5[%c0_9, %c0_10] : memref<1x256xf32, #tpu.memory_space<vmem>>, vector<1x256xf32>
    %13 = vector.broadcast %12 : vector<1x256xf32> to vector<8x256xf32>
    %14 = arith.addf %11, %13 : vector<8x256xf32>
    %cst_11 = arith.constant 0.000000e+00 : f32
    %15 = vector.broadcast %cst_11 : f32 to vector<8x256xf32>
    %16 = arith.maximumf %14, %15 : vector<8x256xf32>
    %c0_12 = arith.constant 0 : index
    %c0_13 = arith.constant 0 : index
    %17 = vector.load %arg6[%c0_12, %c0_13] : memref<1x256xf32, #tpu.memory_space<vmem>>, vector<1x256xf32>
    %18 = vector.broadcast %17 : vector<1x256xf32> to vector<8x256xf32>
    %19 = arith.mulf %16, %18 : vector<8x256xf32>
    %cst_14 = arith.constant dense<0.000000e+00> : vector<8xf32>
    %20 = vector.multi_reduction <add>, %19, %cst_14 [1] : vector<8x256xf32> to vector<8xf32>
    %21 = vector.shape_cast %20 : vector<8xf32> to vector<8x1xf32>
    %c0_15 = arith.constant 0 : index
    %c0_16 = arith.constant 0 : index
    %22 = vector.load %arg7[%c0_15, %c0_16] : memref<1x1xf32, #tpu.memory_space<vmem>>, vector<1x1xf32>
    %23 = vector.broadcast %22 : vector<1x1xf32> to vector<8x1xf32>
    %24 = arith.addf %21, %23 : vector<8x1xf32>
    %25 = arith.negf %24 : vector<8x1xf32>
    %26 = math.exp %25 : vector<8x1xf32>
    %cst_17 = arith.constant 1.000000e+00 : f32
    %27 = vector.broadcast %cst_17 : f32 to vector<8x1xf32>
    %28 = arith.addf %27, %26 : vector<8x1xf32>
    %29 = arith.divf %27, %28 : vector<8x1xf32>
    %c0_18 = arith.constant 0 : index
    %c0_19 = arith.constant 0 : index
    %30 = vector.load %arg8[%c0_18, %c0_19] : memref<8x1xf32, #tpu.memory_space<vmem>>, vector<8x1xf32>
    tpu.vector_store %arg8[%c0_18, %c0_19], %29 {strides = array<i32>} : memref<8x1xf32, #tpu.memory_space<vmem>>, vector<8x1xf32>,
    return
  }
  func.func @transform_0(%arg0: i32) -> (i32, i32) {
    %c0_i32 = arith.constant 0 : i32
    %c0_i32_0 = arith.constant 0 : i32
    return %arg0, %c0_i32 : i32, i32
  }
  func.func @transform_1(%arg0: i32) -> (i32, i32) {
    %c0_i32 = arith.constant 0 : i32
    %c0_i32_0 = arith.constant 0 : i32
    %c0_i32_1 = arith.constant 0 : i32
    return %c0_i32, %c0_i32_0 : i32, i32
  }
  func.func @transform_2(%arg0: i32) -> (i32, i32) {
    %c0_i32 = arith.constant 0 : i32
    %c0_i32_0 = arith.constant 0 : i32
    %c0_i32_1 = arith.constant 0 : i32
    return %c0_i32, %c0_i32_0 : i32, i32
  }
  func.func @transform_3(%arg0: i32) -> (i32, i32) {
    %c0_i32 = arith.constant 0 : i32
    %c0_i32_0 = arith.constant 0 : i32
    %c0_i32_1 = arith.constant 0 : i32
    return %c0_i32, %c0_i32_0 : i32, i32
  }
  func.func @transform_4(%arg0: i32) -> (i32, i32) {
    %c0_i32 = arith.constant 0 : i32
    %c0_i32_0 = arith.constant 0 : i32
    %c0_i32_1 = arith.constant 0 : i32
    return %c0_i32, %c0_i32_0 : i32, i32
  }
  func.func @transform_5(%arg0: i32) -> (i32, i32) {
    %c0_i32 = arith.constant 0 : i32
    %c0_i32_0 = arith.constant 0 : i32
    %c0_i32_1 = arith.constant 0 : i32
    return %c0_i32, %c0_i32_0 : i32, i32
  }
  func.func @transform_6(%arg0: i32) -> (i32, i32) {
    %c0_i32 = arith.constant 0 : i32
    %c0_i32_0 = arith.constant 0 : i32
    %c0_i32_1 = arith.constant 0 : i32
    return %c0_i32, %c0_i32_0 : i32, i32
  }
  func.func @transform_7(%arg0: i32) -> (i32, i32) {
    %c0_i32 = arith.constant 0 : i32
    %c0_i32_0 = arith.constant 0 : i32
    return %arg0, %c0_i32 : i32, i32
  }
}

</mosaic_0001>

<bundles_post_ra>
// kernel: _forward.1
= control target key start
LH: loop header
LB: loop body
LE: loop exit
PB: predicated region body
PF: predicated region fallthrough
CT: control target
= control target key end

     0   :  { %s3573_s0 = inlined_call_operand.hbm [shape: f32[16,784], index: 0, kind: input, shape index: {}]   ;;  %s3574_s1 = inlined_call_operand.hbm [shape: bf16[784,512], index: 1, kind: input, shape index: {}]   ;;  %s3575_s2 = inlined_call_operand.vmem [shape: f32[1,512], index: 2, kind: input, shape index: {}]   ;;  %s3576_s3 = inlined_call_operand.hbm [shape: bf16[512,256], index: 3, kind: input, shape index: {}]   ;;  %s3577_s4 = inlined_call_operand.vmem [shape: f32[1,256], index: 4, kind: input, shape index: {}]   ;;  %s3578_s5 = inlined_call_operand.vmem [shape: f32[1,256], index: 5, kind: input, shape index: {}]   ;;  %s3579_s6 = inlined_call_operand.<no memory space> [shape: f32[1,1], index: 6, kind: input, shape index: {}]   ;;  %s3580_s7 = inlined_call_operand.vmem [shape: f32[16,1], index: 7, kind: output, shape index: {}]  }
   0x1   :  { %v12_v0 = vstv %s3579_s6 }
   0x2   :  { %13 = vst [vmem:[#allocation2] sm:$0x1] %v12_v0 }
   0x3   :  { %14 = vsyncpa [#allocation4], 0 }
   0x4   :  { %16 = vsyncpa [#allocation4 + $0x1], 0 }
   0x5   :  { %17 = vsyncpa [#allocation6], 0  ;;  %s3385_s26 = smov 0   ;;  %s3387_s27 = smov 0  }
   0x6   :  { %s3389_s28 = smov 0   ;;  %s3391_s29 = smov 0  }
   0x7 LB: > { %s3404_s6 = sadd.s32 4294967295, %s3332_s29   ;;  %p43_p0 = scmp.ne.s32.totalorder %s3324_s27, %s3320_s26  ;;  %s3332_s29 = sphi %s3391_s29, %s3595_s29   ;;  %s3328_s28 = sphi %s3389_s28, %s3594_s28   ;;  %s3324_s27 = sphi %s3387_s27, %s3593_s27   ;;  %s3320_s26 = sphi %s3385_s26, %s3592_s26  }
   0x8   : > { %p3581_p1 = scmp.eq.s32.totalorder %s3404_s6, 0  ;;  %p2477_p2 = scmp.ge.s32.totalorder %s3332_s29, 1 }
   0x9   : > { %p206_p3 = scmp.lt.s32.totalorder %s3332_s29, 3  ;;  %s3334_s9 = smov [#allocation5]  }
   0xa   : > { %p3412_p4 = por %p3581_p1, %p43_p0  ;;  %s218_s10 = sshll.u32 %s3334_s9, 4  ;;  %s219_s10 = int_to_ptr.vmem [resolvable:$true] %s218_s10 }
   0xb   : > { %p3416_p5 = pnand %p2477_p2, %p206_p3  ;;  %s3335_s12 = smov [#allocation7]  }
   0xc   : > { %s3584_s30 = scalar_select %p3412_p4, 1, 0 }
   0xd   : > { %s3585_s8 = scalar_select %p3416_p5, 1, 0 }
   0xe   : > { %p2765_p6 = pneg %p3416_p5  ;;  %s234_s13 = sshll.u32 %s3335_s12, 4  ;;  %s235_s13 = int_to_ptr.vmem [resolvable:$true] %s234_s13 }
   0xf   : > { %s3225_s14 = scalar_lea.vmem %s219_s10, 25088  ;;  %p3233_p12 = scmp.lt.s32.totalorder %s219_s10, %s219_s10 }
  0x10   : > { %p3424_p7 = pnand %p2765_p6, %p3581_p1  ;;  %p3226_p9 = scmp.ne.s32.totalorder %s219_s10, %s3225_s14 }
  0x11   : > { %p3234_p13 = scmp.lt.s32.totalorder %s3225_s14, %s3225_s14 }
  0x12   : > { %p3216_p8 = pneg %p3424_p7 }
  0x13   : > { %p3235_p0 = por %p3234_p13, %p3233_p12 }
  0x14   : > { %p3228_p10 = pnand %p3226_p9, %p3216_p8 }
  0x16   : > { %p3229_p11 = pneg %p3228_p10 }
  0x18   : > { %p3236_p2 = pnand %p3235_p0, %p3229_p11 }
  0x1a   : > { %3239 = shalt.err (!%p3236_p2)
}
  0x1b   : > { %s3336_s15 = smov 256   ;;  %s3337_s16 = smov 16  }
  0x1c   : > { %2768 = dma.hbm_to_vmem [thread:$0]  (!%p3424_p7), %s3574_s1, 25088, %s219_s10, [#allocation6], %s3336_s15, %s3336_s15, %s3337_s16  }
  0x1d   : > { %s3251_s19 = scalar_lea.vmem %s235_s13, 8192  ;;  %p3259_p10 = scmp.lt.s32.totalorder %s235_s13, %s235_s13 }
  0x1e   : > { %p3252_p3 = scmp.ne.s32.totalorder %s235_s13, %s3251_s19  ;;  %p3260_p1 = scmp.lt.s32.totalorder %s3251_s19, %s3251_s19 }
  0x20   : > { %p3254_p6 = pnand %p3252_p3, %p3216_p8  ;;  %p3261_p12 = por %p3260_p1, %p3259_p10 }
  0x22   : > { %p3255_p9 = pneg %p3254_p6 }
  0x24   : > { %p3262_p11 = pnand %p3261_p12, %p3255_p9 }
  0x26   : > { %3265 = shalt.err (!%p3262_p11)
}
  0x27   : > { %s3338_s20 = smov 128   ;;  %s3339_s21 = smov 8  }
  0x28   : > { %2771 = dma.hbm_to_vmem [thread:$0]  (!%p3424_p7), %s3576_s3, 8192, %s235_s13, [#allocation6], %s3338_s20, %s3338_s20, %s3339_s21  }
  0x29   : > { %s3447_s24 = sadd.s32 1, %s3332_s29   ;;  %s30_s26 = sadd.s32 1, %s3328_s28 }
  0x2a   : > { %s27_s25 = ssub.s32 %s3332_s29, %s3447_s24  ;;  %p37_p8 = scmp.ne.s32.totalorder %s3328_s28, %s3324_s27 }
  0x2b   : > { %p28_p1 = scmp.eq.s32.totalorder %s27_s25, 0  ;;  %p38_p13 = scmp.eq.s32.totalorder %s3332_s29, 0 }
  0x2c   : > { %p2778_p2 = scmp.lt.s32.totalorder %s3332_s29, 2  ;;  %s257_s10 = sand.u32 1, %s3328_s28  }
  0x2d   : > { %s3456_s9 = scalar_select %p28_p1, %s3328_s28, %s30_s26  }
  0x2e   : > { %p39_p0 = por %p38_p13, %p37_p8  ;;  %s2753_s12 = smul.u32 896, %s3332_s29 }
  0x2f   : > { %s2752_s14 = smul.u32 56, %s257_s10  ;;  %s258_s19 = scalar_lea.sflag [#allocation4], %s257_s10 }
  0x30   : > { %p3461_p3 = pnand %p2778_p2, %p39_p0  ;;  %s3468_s16 = scalar_lea.hbm %s3573_s0, %s2753_s12 }
  0x31   : > { %s261_s17 = scalar_lea.vmem [#allocation3], %s2752_s14  ;;  %s3266_s20 = scalar_lea.hbm %s3468_s16, 896 }
  0x32   : > { %s269_s18 = sshll.u32 %s261_s17, 4  ;;  %p3267_p7 = scmp.ne.s32.totalorder %s3468_s16, %s3266_s20  ;;  %s270_s18 = int_to_ptr.vmem [resolvable:$true] %s269_s18 }
  0x33   : > { %p3268_p6 = pneg %p3461_p3  ;;  %s3271_s22 = scalar_lea.hbm %s3573_s0, 1792 }
  0x34   : > { %p3272_p12 = scmp.lt.s32.totalorder %s3468_s16, %s3573_s0  ;;  %p3273_p11 = scmp.lt.s32.totalorder %s3271_s22, %s3266_s20 }
  0x35   : > { %p3269_p9 = pnand %p3268_p6, %p3267_p7 }
  0x36   : > { %p3274_p1 = por %p3273_p11, %p3272_p12 }
  0x37   : > { %p3270_p10 = pneg %p3269_p9 }
  0x39   : > { %p3275_p8 = pnand %p3274_p1, %p3270_p10 }
  0x3b   : > { %3278 = shalt.err (!%p3275_p8)
}
  0x3c   : > { %s3279_s26 = scalar_lea.vmem %s270_s18, 896  ;;  %s3340_s10 = smov [#allocation3]  }
  0x3d   : > { %p3280_p13 = scmp.ne.s32.totalorder %s270_s18, %s3279_s26  ;;  %s3284_s12 = sshll.u32 %s3340_s10, 4  ;;  %s3285_s12 = int_to_ptr.vmem [resolvable:$false] %s3284_s12 }
  0x3e   : > { %s3286_s14 = scalar_lea.vmem %s3285_s12, 1792  ;;  %p3287_p7 = scmp.lt.s32.totalorder %s270_s18, %s3285_s12 }
  0x3f   : > { %p3282_p0 = pnand %p3280_p13, %p3268_p6  ;;  %p3288_p9 = scmp.lt.s32.totalorder %s3286_s14, %s3279_s26 }
  0x41   : > { %p3283_p2 = pneg %p3282_p0  ;;  %p3289_p4 = por %p3288_p9, %p3287_p7 }
  0x43   : > { %p3290_p5 = pnand %p3289_p4, %p3283_p2 }
  0x45   : > { %3293 = shalt.err (!%p3290_p5)
}
  0x46   : > { %2775 = dma.hbm_to_vmem [thread:$0]  (!%p3461_p3), %s3468_s16, 896, %s270_s18, %s258_s19  }
  0x47   : > { %p3588_p10 = scmp.ne.s32.totalorder %s3585_s8, 0 }
  0x48   : > { %s280_s13 = sand.u32 (!%p3588_p10), 1, %s3324_s27   ;;  %p3589_p6 = scmp.ne.s32.totalorder (!%p3588_p10), %s3584_s30, 0 }
  0x49   : > { %278 = sbr.rel (%p3588_p10) target bundleno = 864 (0x360), region = 48  ;;  %s281_s17 = scalar_lea.sflag (!%p3588_p10), [#allocation4], %s280_s13 }
  0x4a   : > { %s2754_s15 = smul.u32 (!%p3588_p10), 56, %s280_s13 }
  0x4c   : > { %s3487_s20 = scalar_lea.vmem (!%p3588_p10), [#allocation3], %s2754_s15 }
  0x4e   : > { %3311 = dma.done.wait (%p3589_p6), %s281_s17, 896  }
  0x4f   : > { %3313 = vsyncadd (%p3589_p6), %s281_s17, 4294966400  ;;  %p3590_p4 = scmp.eq.s32.totalorder %s3404_s6, 0 }
  0x51   : > { %3315 = dma.done.wait (%p3590_p4), [#allocation6], 33280   ;;  %p3591_p5 = pmov %p3590_p4 }
  0x52   : > { %v2820_v1 = vld [vmem:[#allocation5 + $0xe4] ss:$16 sps:$4 sm:$0xff]   ;;  %v2824_v3 = vld [vmem:[#allocation5 + $0xe0] ss:$16 sps:$4 sm:$0xff]   ;;  %vm1539_vm0 = vcmask 130048   ;;  %p322_p3 = scmp.lt.s32.totalorder %s3404_s6, 1 }
  0x53   : > { %3317 = vsyncadd (%p3591_p5), [#allocation6], 4294934016  ;;  %v2822_v2 = vld [vmem:[#allocation5 + $0x2e4] ss:$16 sps:$4 sm:$0xff]   ;;  %1543 = vmatprep.subr.bf16.mxu0 %v2820_v1  ;;  %v2825_v4 = vld [vmem:[#allocation5 + $0x2e0] ss:$16 sps:$4 sm:$0xff]  }
  0x54   : > { %1584 = vmatprep.subr.bf16.mxu1 %v2822_v2  ;;  %v2826_v5 = vld [vmem:[#allocation5 + $0xc4] ss:$16 sps:$4 sm:$0xff]   ;;  %1544 = vmatpush1.bf16.msra.mxu0 %v2824_v3  ;;  %v2830_v7 = vld [vmem:[#allocation5 + $0xc0] ss:$16 sps:$4 sm:$0xff]   ;;  %s3597_s6 = smov (!%p322_p3, %s3404_s6), 1  ;;  %vm2390_vm1 = vcmask 7168  }
  0x55   : > { %1585 = vmatpush1.bf16.msra.mxu1 %v2825_v4  ;;  %v2828_v6 = vld [vmem:[#allocation5 + $0x2c4] ss:$16 sps:$4 sm:$0xff]   ;;  %1545 = vmatprep.subr.bf16.mxu0 %v2826_v5  ;;  %v2831_v8 = vld [vmem:[#allocation5 + $0x2c0] ss:$16 sps:$4 sm:$0xff]   ;;  %s2485_s29 = sshll.u32 %s3597_s6, 3 }
  0x56   : > { %1586 = vmatprep.subr.bf16.mxu1 %v2828_v6  ;;  %v2832_v9 = vld [vmem:[#allocation5 + $0xa4] ss:$16 sps:$4 sm:$0xff]   ;;  %v2836_v11 = vld [vmem:[#allocation5 + $0xa0] ss:$16 sps:$4 sm:$0xff]   ;;  %s325_s23 = scalar_lea.vmem %s3580_s7, %s2485_s29 }
  0x57   : > { %v2834_v10 = vld [vmem:[#allocation5 + $0x2a4] ss:$16 sps:$4 sm:$0xff]   ;;  %v2837_v12 = vld [vmem:[#allocation5 + $0x2a0] ss:$16 sps:$4 sm:$0xff]  }
  0x58   : > { %1546 = vmatpush1.bf16.msra.mxu0 %v2830_v7  ;;  %v2838_v13 = vld [vmem:[#allocation5 + $0x84] ss:$16 sps:$4 sm:$0xff]   ;;  %v2842_v15 = vld [vmem:[#allocation5 + $0x80] ss:$16 sps:$4 sm:$0xff]  }
  0x59   : > { %1587 = vmatpush1.bf16.msra.mxu1 %v2831_v8  ;;  %1547 = vmatprep.subr.bf16.mxu0 %v2832_v9  ;;  %v2840_v14 = vld [vmem:[#allocation5 + $0x284] ss:$16 sps:$4 sm:$0xff]   ;;  %v2843_v16 = vld [vmem:[#allocation5 + $0x280] ss:$16 sps:$4 sm:$0xff]  }
  0x5a   : > { %1588 = vmatprep.subr.bf16.mxu1 %v2834_v10  ;;  %v2844_v17 = vld [vmem:[#allocation5 + $0x64] ss:$16 sps:$4 sm:$0xff]   ;;  %v2848_v19 = vld [vmem:[#allocation5 + $0x60] ss:$16 sps:$4 sm:$0xff]  }
  0x5b   : > { %v2846_v18 = vld [vmem:[#allocation5 + $0x264] ss:$16 sps:$4 sm:$0xff]   ;;  %v2849_v20 = vld [vmem:[#allocation5 + $0x260] ss:$16 sps:$4 sm:$0xff]  }
  0x5c   : > { %1548 = vmatpush1.bf16.msra.mxu0 %v2836_v11  ;;  %v2850_v21 = vld [vmem:[#allocation5 + $0x44] ss:$16 sps:$4 sm:$0xff]   ;;  %v2854_v23 = vld [vmem:[#allocation5 + $0x40] ss:$16 sps:$4 sm:$0xff]  }
  0x5d   : > { %1589 = vmatpush1.bf16.msra.mxu1 %v2837_v12  ;;  %1549 = vmatprep.subr.bf16.mxu0 %v2838_v13  ;;  %v2852_v22 = vld [vmem:[#allocation5 + $0x244] ss:$16 sps:$4 sm:$0xff]   ;;  %v2855_v24 = vld [vmem:[#allocation5 + $0x240] ss:$16 sps:$4 sm:$0xff]  }
  0x5e   : > { %1590 = vmatprep.subr.bf16.mxu1 %v2840_v14  ;;  %v2856_v25 = vld [vmem:[#allocation5 + $0x24] ss:$16 sps:$4 sm:$0xff]   ;;  %v2860_v27 = vld [vmem:[#allocation5 + $0x20] ss:$16 sps:$4 sm:$0xff]   ;;  %v2927_v14 = vld [vmem:[#allocation5 + $0xec] ss:$16 sps:$4 sm:$0xff]  }
  0x5f   : > { %v2858_v26 = vld [vmem:[#allocation5 + $0x224] ss:$16 sps:$4 sm:$0xff]   ;;  %v2861_v28 = vld [vmem:[#allocation5 + $0x220] ss:$16 sps:$4 sm:$0xff]  }
  0x60   : > { %1550 = vmatpush1.bf16.msra.mxu0 %v2842_v15  ;;  %v2862_v29 = vld [vmem:[#allocation5 + $0x4] ss:$16 sps:$4 sm:$0xff]   ;;  %v2866_v31 = vld [vmem:[#allocation5] ss:$16 sps:$4 sm:$0xff]  }
  0x61   : > { %1591 = vmatpush1.bf16.msra.mxu1 %v2843_v16  ;;  %1551 = vmatprep.subr.bf16.mxu0 %v2844_v17  ;;  %v2864_v30 = vld [vmem:[#allocation5 + $0x204] ss:$16 sps:$4 sm:$0xff]   ;;  %v2867_v32 = vld [vmem:[#allocation5 + $0x200] ss:$16 sps:$4 sm:$0xff]   ;;  %v3341_v17 = vmov 0  }
  0x62   : > { %1592 = vmatprep.subr.bf16.mxu1 %v2846_v18  ;;  %v2868_v33 = vld [vmem:[#allocation5 + $0x1e4] ss:$16 sps:$4 sm:$0xff]   ;;  %v2872_v35 = vld [vmem:[#allocation5 + $0x1e0] ss:$16 sps:$4 sm:$0xff]  }
  0x63   : > { %v2870_v34 = vld [vmem:[#allocation5 + $0x3e4] ss:$16 sps:$4 sm:$0xff]   ;;  %v2873_v36 = vld [vmem:[#allocation5 + $0x3e0] ss:$16 sps:$4 sm:$0xff]  }
  0x64   : > { %1552 = vmatpush1.bf16.msra.mxu0 %v2848_v19  ;;  %v2874_v37 = vld [vmem:[#allocation5 + $0x1c4] ss:$16 sps:$4 sm:$0xff]   ;;  %v2878_v39 = vld [vmem:[#allocation5 + $0x1c0] ss:$16 sps:$4 sm:$0xff]   ;;  %v2925_v19 = vld [vmem:[#allocation5 + $0xe8] ss:$16 sps:$4 sm:$0xff]  }
  0x65   : > { %1593 = vmatpush1.bf16.msra.mxu1 %v2849_v20  ;;  %1553 = vmatprep.subr.bf16.mxu0 %v2850_v21  ;;  %v2876_v38 = vld [vmem:[#allocation5 + $0x3c4] ss:$16 sps:$4 sm:$0xff]   ;;  %v2879_v40 = vld [vmem:[#allocation5 + $0x3c0] ss:$16 sps:$4 sm:$0xff]  }
  0x66   : > { %1594 = vmatprep.subr.bf16.mxu1 %v2852_v22  ;;  %v2880_v41 = vld [vmem:[#allocation5 + $0x1a4] ss:$16 sps:$4 sm:$0xff]   ;;  %v2884_v43 = vld [vmem:[#allocation5 + $0x1a0] ss:$16 sps:$4 sm:$0xff]   ;;  %v2933_v22 = vld [vmem:[#allocation5 + $0xcc] ss:$16 sps:$4 sm:$0xff]  }
  0x67   : > { %v2882_v42 = vld [vmem:[#allocation5 + $0x3a4] ss:$16 sps:$4 sm:$0xff]   ;;  %v2885_v44 = vld [vmem:[#allocation5 + $0x3a0] ss:$16 sps:$4 sm:$0xff]  }
  0x68   : > { %1554 = vmatpush1.bf16.msra.mxu0 %v2854_v23  ;;  %v2886_v45 = vld [vmem:[#allocation5 + $0x184] ss:$16 sps:$4 sm:$0xff]   ;;  %v2890_v48 = vld [vmem:[#allocation5 + $0x180] ss:$16 sps:$4 sm:$0xff]  }
  0x69   : > { %1595 = vmatpush1.bf16.msra.mxu1 %v2855_v24  ;;  %1555 = vmatprep.subr.bf16.mxu0 %v2856_v25  ;;  %v2888_v46 = vld [vmem:[#allocation5 + $0x384] ss:$16 sps:$4 sm:$0xff]   ;;  %v2891_v49 = vld [vmem:[#allocation5 + $0x380] ss:$16 sps:$4 sm:$0xff]   ;;  %v2931_v24 = vld [vmem:[#allocation5 + $0xc8] ss:$16 sps:$4 sm:$0xff]  }
  0x6a   : > { %1596 = vmatprep.subr.bf16.mxu1 %v2858_v26  ;;  %v328_v47 = vld [vmem:[%s3487_s20 + $0x8] sm:$0xff]  ;;  %v330_v51 = vld [vmem:[%s3487_s20 + $0x18] sm:$0xff]  ;;  %v327_v5 = vld [vmem:[%s3487_s20] sm:$0xff] }
  0x6b   : > { %v3498_v50 = vpack.c.bf16 %v328_v47, %v328_v47  ;;  %v2892_v52 = vld [vmem:[#allocation5 + $0x164] ss:$16 sps:$4 sm:$0xff]   ;;  %v3501_v53 = vpack.c.bf16 %v330_v51, %v330_v51  ;;  %v2896_v55 = vld [vmem:[#allocation5 + $0x160] ss:$16 sps:$4 sm:$0xff]   ;;  %v3507_v9 = vpack.c.bf16 %v327_v5, %v327_v5  ;;  %v2939_v26 = vld [vmem:[#allocation5 + $0xac] ss:$16 sps:$4 sm:$0xff]  }
  0x6c   : > { %1556 = vmatpush1.bf16.msra.mxu0 %v2860_v27  ;;  %v2894_v54 = vld [vmem:[#allocation5 + $0x364] ss:$16 sps:$4 sm:$0xff]   ;;  %v2897_v56 = vld [vmem:[#allocation5 + $0x360] ss:$16 sps:$4 sm:$0xff]   ;;  %v2999_v5 = vld [vmem:[#allocation5 + $0x16c] ss:$16 sps:$4 sm:$0xff]  }
  0x6d   : > { %1597 = vmatpush1.bf16.msra.mxu1 %v2861_v28  ;;  %1557 = vmatprep.subr.bf16.mxu0 %v2862_v29  ;;  %v2898_v57 = vld [vmem:[#allocation5 + $0x144] ss:$16 sps:$4 sm:$0xff]   ;;  %v2902_v59 = vld [vmem:[#allocation5 + $0x140] ss:$16 sps:$4 sm:$0xff]   ;;  %v2937_v28 = vld [vmem:[#allocation5 + $0xa8] ss:$16 sps:$4 sm:$0xff]  }
  0x6e   : > { %1598 = vmatprep.subr.bf16.mxu1 %v2864_v30  ;;  %1575 = vmatprep.mubr.bf16.mxu0 %v3498_v50  ;;  %v2900_v58 = vld [vmem:[#allocation5 + $0x344] ss:$16 sps:$4 sm:$0xff]   ;;  %v2903_v60 = vld [vmem:[#allocation5 + $0x340] ss:$16 sps:$4 sm:$0xff]   ;;  %v2945_v30 = vld [vmem:[#allocation5 + $0x8c] ss:$16 sps:$4 sm:$0xff]  }
  0x6f   : > { %1616 = vmatprep.mubr.bf16.mxu1 %v3501_v53  ;;  %v2904_v61 = vld [vmem:[#allocation5 + $0x124] ss:$16 sps:$4 sm:$0xff]   ;;  %v2908_v63 = vld [vmem:[#allocation5 + $0x120] ss:$16 sps:$4 sm:$0xff]  }
  0x70   : > { %1558 = vmatpush1.bf16.msra.mxu0 %v2866_v31  ;;  %v2906_v62 = vld [vmem:[#allocation5 + $0x324] ss:$16 sps:$4 sm:$0xff]   ;;  %v2909_v0 = vld [vmem:[#allocation5 + $0x320] ss:$16 sps:$4 sm:$0xff]  }
  0x71   : > { %1599 = vmatpush1.bf16.msra.mxu1 %v2867_v32  ;;  %1559 = vmatprep.subr.bf16.mxu0 %v2868_v33  ;;  %v2910_v1 = vld [vmem:[#allocation5 + $0x104] ss:$16 sps:$4 sm:$0xff]   ;;  %v2914_v3 = vld [vmem:[#allocation5 + $0x100] ss:$16 sps:$4 sm:$0xff]   ;;  %v2943_v32 = vld [vmem:[#allocation5 + $0x88] ss:$16 sps:$4 sm:$0xff]  }
  0x72   : > { %1600 = vmatprep.subr.bf16.mxu1 %v2870_v34  ;;  %v2912_v2 = vld [vmem:[#allocation5 + $0x304] ss:$16 sps:$4 sm:$0xff]   ;;  %v2915_v4 = vld [vmem:[#allocation5 + $0x300] ss:$16 sps:$4 sm:$0xff]   ;;  %v2951_v34 = vld [vmem:[#allocation5 + $0x6c] ss:$16 sps:$4 sm:$0xff]  }
  0x73   : > { %v329_v6 = vld [vmem:[%s3487_s20 + $0x10] sm:$0xff] }
  0x74   : > { %1560 = vmatpush2.bf16.msra.mxu0 %v2872_v35  ;;  %v2918_v7 = vld [vmem:[#allocation5 + $0x4e4] ss:$16 sps:$4 sm:$0xff]   ;;  %v3509_v10 = vpack.c.bf16 %v329_v6, %v329_v6  ;;  %v2916_v11 = vld [vmem:[#allocation5 + $0x4e0] ss:$16 sps:$4 sm:$0xff]  }
  0x75   : > { %1601 = vmatpush2.bf16.msra.mxu1 %v2873_v36  ;;  %1561 = vmatprep.subr.bf16.mxu0 %v2874_v37  ;;  %v2921_v8 = vld [vmem:[#allocation5 + $0x604] ss:$16 sps:$4 sm:$0xff]   ;;  %v2919_v12 = vld [vmem:[#allocation5 + $0x600] ss:$16 sps:$4 sm:$0xff]  }
  0x76   : > { %1602 = vmatprep.subr.bf16.mxu1 %v2876_v38  ;;  %v2924_v13 = vld [vmem:[#allocation5 + $0x4c4] ss:$16 sps:$4 sm:$0xff]   ;;  %v2922_v15 = vld [vmem:[#allocation5 + $0x4c0] ss:$16 sps:$4 sm:$0xff]   ;;  %v2949_v38 = vld [vmem:[#allocation5 + $0x68] ss:$16 sps:$4 sm:$0xff]  }
  0x77   : > { %v333_v16 = vld [vmem:[%s3487_s20 + $0x30] sm:$0xff]  ;;  %v332_v36 = vld [vmem:[%s3487_s20 + $0x28] sm:$0xff] }
  0x78   : > { %1562 = vmatpush2.bf16.msra.mxu0 %v2878_v39  ;;  %v2930_v18 = vld [vmem:[#allocation5 + $0x4a4] ss:$16 sps:$4 sm:$0xff]   ;;  %v3515_v20 = vpack.c.bf16 %v333_v16, %v333_v16  ;;  %v2928_v21 = vld [vmem:[#allocation5 + $0x4a0] ss:$16 sps:$4 sm:$0xff]   ;;  %v3521_v37 = vpack.c.bf16 %v332_v36, %v332_v36  ;;  %v3038_v36 = vld [vmem:[#allocation5 + $0x26c] ss:$16 sps:$4 sm:$0xff]  }
  0x79   : > { %1603 = vmatpush2.bf16.msra.mxu1 %v2879_v40  ;;  %1563 = vmatprep.subr.bf16.mxu0 %v2880_v41  ;;  %v2936_v23 = vld [vmem:[#allocation5 + $0x484] ss:$16 sps:$4 sm:$0xff]   ;;  %v2934_v25 = vld [vmem:[#allocation5 + $0x480] ss:$16 sps:$4 sm:$0xff]   ;;  %v2957_v40 = vld [vmem:[#allocation5 + $0x4c] ss:$16 sps:$4 sm:$0xff]  }
  0x7a   : > { %1604 = vmatprep.subr.bf16.mxu1 %v2882_v42  ;;  %v2942_v27 = vld [vmem:[#allocation5 + $0x464] ss:$16 sps:$4 sm:$0xff]   ;;  %v2940_v29 = vld [vmem:[#allocation5 + $0x460] ss:$16 sps:$4 sm:$0xff]   ;;  %v2955_v42 = vld [vmem:[#allocation5 + $0x48] ss:$16 sps:$4 sm:$0xff]  }
  0x7b   : > { %v2948_v31 = vld [vmem:[#allocation5 + $0x444] ss:$16 sps:$4 sm:$0xff]   ;;  %v2946_v33 = vld [vmem:[#allocation5 + $0x440] ss:$16 sps:$4 sm:$0xff]  }
  0x7c   : > { %1564 = vmatpush2.bf16.msra.mxu0 %v2884_v43  ;;  %v2954_v35 = vld [vmem:[#allocation5 + $0x424] ss:$16 sps:$4 sm:$0xff]   ;;  %v2952_v39 = vld [vmem:[#allocation5 + $0x420] ss:$16 sps:$4 sm:$0xff]  }
  0x7d   : > { %1605 = vmatpush2.bf16.msra.mxu1 %v2885_v44  ;;  %1565 = vmatprep.subr.bf16.mxu0 %v2886_v45  ;;  %v2960_v41 = vld [vmem:[#allocation5 + $0x404] ss:$16 sps:$4 sm:$0xff]   ;;  %v2958_v43 = vld [vmem:[#allocation5 + $0x400] ss:$16 sps:$4 sm:$0xff]   ;;  %v2963_v44 = vld [vmem:[#allocation5 + $0x2c] ss:$16 sps:$4 sm:$0xff]  }
  0x7e   : > { %1606 = vmatprep.subr.bf16.mxu1 %v2888_v46  ;;  %v2966_v45 = vld [vmem:[#allocation5 + $0x5e4] ss:$16 sps:$4 sm:$0xff]   ;;  %v2961_v46 = vld [vmem:[#allocation5 + $0x28] ss:$16 sps:$4 sm:$0xff]   ;;  %v2964_v47 = vld [vmem:[#allocation5 + $0x5e0] ss:$16 sps:$4 sm:$0xff]  }
  0x7f   : > { %v2970_v51 = vld [vmem:[#allocation5 + $0x5c0] ss:$16 sps:$4 sm:$0xff]   ;;  %v3002_v6 = vld [vmem:[#allocation5 + $0x524] ss:$16 sps:$4 sm:$0xff]  }
  0x80   : > { %1566 = vmatpush2.bf16.msra.mxu0 %v2890_v48  ;;  %v2969_v48 = vld [vmem:[#allocation5 + $0xc] ss:$16 sps:$4 sm:$0xff]  }
  0x81   : > { %1607 = vmatpush2.bf16.msra.mxu1 %v2891_v49  ;;  %1567 = vmatprep.subr.bf16.mxu0 %v2892_v52  ;;  %v2972_v49 = vld [vmem:[#allocation5 + $0x5c4] ss:$16 sps:$4 sm:$0xff]   ;;  %v2975_v52 = vld [vmem:[#allocation5 + $0x1ec] ss:$16 sps:$4 sm:$0xff]  }
  0x82   : > { %1608 = vmatprep.subr.bf16.mxu1 %v2894_v54  ;;  %v2978_v54 = vld [vmem:[#allocation5 + $0x5a4] ss:$16 sps:$4 sm:$0xff]  }
  0x83   : > { %v331_v16 = vld [vmem:[%s3487_s20 + $0x20] sm:$0xff] }
  0x84   : > { %1568 = vmatpush2.bf16.msra.mxu0 %v2896_v55  ;;  %v2973_v55 = vld [vmem:[#allocation5 + $0x1e8] ss:$16 sps:$4 sm:$0xff]  }
  0x85   : > { %1609 = vmatpush2.bf16.msra.mxu1 %v2897_v56  ;;  %1569 = vmatprep.subr.bf16.mxu0 %v2898_v57  ;;  %v2976_v56 = vld [vmem:[#allocation5 + $0x5a0] ss:$16 sps:$4 sm:$0xff]   ;;  %v2981_v57 = vld [vmem:[#allocation5 + $0x1cc] ss:$16 sps:$4 sm:$0xff]  }
  0x86   : > { %1610 = vmatprep.subr.bf16.mxu1 %v2900_v58  ;;  %v2984_v58 = vld [vmem:[#allocation5 + $0x584] ss:$16 sps:$4 sm:$0xff]  }
  0x88   : > { %1570 = vmatpush2.bf16.msra.mxu0 %v2902_v59  ;;  %v2979_v59 = vld [vmem:[#allocation5 + $0x1c8] ss:$16 sps:$4 sm:$0xff]  }
  0x89   : > { %1611 = vmatpush2.bf16.msra.mxu1 %v2903_v60  ;;  %1571 = vmatprep.subr.bf16.mxu0 %v2904_v61  ;;  %v2982_v60 = vld [vmem:[#allocation5 + $0x580] ss:$16 sps:$4 sm:$0xff]   ;;  %v2987_v61 = vld [vmem:[#allocation5 + $0x1ac] ss:$16 sps:$4 sm:$0xff]  }
  0x8a   : > { %1612 = vmatprep.subr.bf16.mxu1 %v2906_v62  ;;  %v2990_v62 = vld [vmem:[#allocation5 + $0x564] ss:$16 sps:$4 sm:$0xff]  }
  0x8c   : > { %1572 = vmatpush2.bf16.msra.mxu0 %v2908_v63  ;;  %v2985_v63 = vld [vmem:[#allocation5 + $0x1a8] ss:$16 sps:$4 sm:$0xff]  }
  0x8d   : > { %1613 = vmatpush2.bf16.msra.mxu1 %v2909_v0  ;;  %1573 = vmatprep.subr.bf16.mxu0 %v2910_v1  ;;  %v2988_v0 = vld [vmem:[#allocation5 + $0x560] ss:$16 sps:$4 sm:$0xff]   ;;  %v2993_v1 = vld [vmem:[#allocation5 + $0x18c] ss:$16 sps:$4 sm:$0xff]  }
  0x8e   : > { %1614 = vmatprep.subr.bf16.mxu1 %v2912_v2  ;;  %v2996_v2 = vld [vmem:[#allocation5 + $0x544] ss:$16 sps:$4 sm:$0xff]  }
  0x90   : > { %1574 = vmatpush2.bf16.msra.mxu0 %v2914_v3  ;;  %v2991_v3 = vld [vmem:[#allocation5 + $0x188] ss:$16 sps:$4 sm:$0xff]  }
  0x91   : > { %1615 = vmatpush2.bf16.msra.mxu1 %v2915_v4  ;;  %1625 = vmatprep.subr.bf16.mxu0 %v2918_v7  ;;  %v2994_v4 = vld [vmem:[#allocation5 + $0x540] ss:$16 sps:$4 sm:$0xff]   ;;  %v2997_v7 = vld [vmem:[#allocation5 + $0x168] ss:$16 sps:$4 sm:$0xff]  }
  0x92   : > { %1680 = vmatprep.subr.bf16.mxu1 %v2921_v8  ;;  %v3000_v8 = vld [vmem:[#allocation5 + $0x520] ss:$16 sps:$4 sm:$0xff]  }
  0x93   : > { %1576 = vmatmul.mubr.bf16.vlgmr.msra.gmra.mxu0 %v3507_v9 }
  0x94   : > { %1617 = vmatmul.mubr.bf16.vlgmr.msra.gmra.mxu1 %v3509_v10  ;;  %1626 = vmatpush1.bf16.msra.mxu0 %v2916_v11  ;;  %v3005_v11 = vld [vmem:[#allocation5 + $0x14c] ss:$16 sps:$4 sm:$0xff]  }
  0x95   : > { %1681 = vmatpush1.bf16.msra.mxu1 %v2919_v12  ;;  %1627 = vmatprep.subr.bf16.mxu0 %v2924_v13  ;;  %v3008_v12 = vld [vmem:[#allocation5 + $0x504] ss:$16 sps:$4 sm:$0xff]   ;;  %v3003_v13 = vld [vmem:[#allocation5 + $0x148] ss:$16 sps:$4 sm:$0xff]  }
  0x96   : > { %1698 = vmatprep.mubr.bf16.mxu1 %v3341_v17  ;;  %1707 = vmatprep.subr.bf16.mxu1 %v2927_v14  ;;  %v3006_v14 = vld [vmem:[#allocation5 + $0x500] ss:$16 sps:$4 sm:$0xff]  }
  0x97   : > { %1657 = vmatprep.mubr.bf16.mxu0 %v3521_v37 }
  0x98   : > { %1628 = vmatpush1.bf16.msra.mxu0 %v2922_v15  ;;  %v3011_v15 = vld [vmem:[#allocation5 + $0x12c] ss:$16 sps:$4 sm:$0xff]  }
  0x99   : > { %1629 = vmatprep.subr.bf16.mxu0 %v2930_v18  ;;  %v3014_v18 = vld [vmem:[#allocation5 + $0x2ec] ss:$16 sps:$4 sm:$0xff]  }
  0x9c   : > { %2682 = vmatmul.mubr.msk.bf16.vlgmr.msra.gmra.mxu1 %vm1539_vm0, %v3515_v20  ;;  %1630 = vmatpush1.bf16.msra.mxu0 %v2928_v21  ;;  %v3525_v21 = vpack.c.bf16 %v331_v16, %v331_v16  ;;  %v3101_v16 = vld [vmem:[#allocation5 + $0x54c] ss:$16 sps:$4 sm:$0xff]  }
  0x9d   : > { %1708 = vmatpush1.bf16.msra.mxu1 %v2925_v19  ;;  %1631 = vmatprep.subr.bf16.mxu0 %v2936_v23  ;;  %v3009_v19 = vld [vmem:[#allocation5 + $0x128] ss:$16 sps:$4 sm:$0xff]   ;;  %v3017_v23 = vld [vmem:[#allocation5 + $0x10c] ss:$16 sps:$4 sm:$0xff]  }
  0x9e   : > { %1709 = vmatprep.subr.bf16.mxu1 %v2933_v22  ;;  %1739 = vmatprep.mubr.bf16.mxu1 %v3498_v50  ;;  %v2967_v50 = vld [vmem:[#allocation5 + $0x8] ss:$16 sps:$4 sm:$0xff]  }
  0x9f   : > { %v3012_v22 = vld [vmem:[#allocation5 + $0x2e8] ss:$16 sps:$4 sm:$0xff]  }
  0xa0   : > { %1632 = vmatpush1.bf16.msra.mxu0 %v2934_v25  ;;  %v3015_v25 = vld [vmem:[#allocation5 + $0x108] ss:$16 sps:$4 sm:$0xff]  }
  0xa1   : > { %1710 = vmatpush1.bf16.msra.mxu1 %v2931_v24  ;;  %1633 = vmatprep.subr.bf16.mxu0 %v2942_v27  ;;  %v3020_v24 = vld [vmem:[#allocation5 + $0x2cc] ss:$16 sps:$4 sm:$0xff]  }
  0xa2   : > { %1711 = vmatprep.subr.bf16.mxu1 %v2939_v26  ;;  %v3018_v26 = vld [vmem:[#allocation5 + $0x2c8] ss:$16 sps:$4 sm:$0xff]   ;;  %v3023_v27 = vld [vmem:[#allocation5 + $0x4ec] ss:$16 sps:$4 sm:$0xff]  }
  0xa4   : > { %1634 = vmatpush1.bf16.msra.mxu0 %v2940_v29  ;;  %v3021_v29 = vld [vmem:[#allocation5 + $0x4e8] ss:$16 sps:$4 sm:$0xff]  }
  0xa5   : > { %1712 = vmatpush1.bf16.msra.mxu1 %v2937_v28  ;;  %1635 = vmatprep.subr.bf16.mxu0 %v2948_v31  ;;  %v3026_v28 = vld [vmem:[#allocation5 + $0x2ac] ss:$16 sps:$4 sm:$0xff]  }
  0xa6   : > { %1713 = vmatprep.subr.bf16.mxu1 %v2945_v30  ;;  %v3024_v30 = vld [vmem:[#allocation5 + $0x2a8] ss:$16 sps:$4 sm:$0xff]   ;;  %v3029_v31 = vld [vmem:[#allocation5 + $0x4cc] ss:$16 sps:$4 sm:$0xff]  }
  0xa8   : > { %1636 = vmatpush1.bf16.msra.mxu0 %v2946_v33  ;;  %v3027_v33 = vld [vmem:[#allocation5 + $0x4c8] ss:$16 sps:$4 sm:$0xff]  }
  0xa9   : > { %1714 = vmatpush1.bf16.msra.mxu1 %v2943_v32  ;;  %1637 = vmatprep.subr.bf16.mxu0 %v2954_v35  ;;  %v3032_v32 = vld [vmem:[#allocation5 + $0x28c] ss:$16 sps:$4 sm:$0xff]  }
  0xaa   : > { %1715 = vmatprep.subr.bf16.mxu1 %v2951_v34  ;;  %v3030_v34 = vld [vmem:[#allocation5 + $0x288] ss:$16 sps:$4 sm:$0xff]   ;;  %v3035_v35 = vld [vmem:[#allocation5 + $0x4ac] ss:$16 sps:$4 sm:$0xff]  }
  0xac   : > { %1638 = vmatpush1.bf16.msra.mxu0 %v2952_v39  ;;  %v3041_v39 = vld [vmem:[#allocation5 + $0x48c] ss:$16 sps:$4 sm:$0xff]  }
  0xad   : > { %1716 = vmatpush1.bf16.msra.mxu1 %v2949_v38  ;;  %1639 = vmatprep.subr.bf16.mxu0 %v2960_v41  ;;  %v3033_v38 = vld [vmem:[#allocation5 + $0x4a8] ss:$16 sps:$4 sm:$0xff]  }
  0xae   : > { %1717 = vmatprep.subr.bf16.mxu1 %v2957_v40  ;;  %v3044_v40 = vld [vmem:[#allocation5 + $0x24c] ss:$16 sps:$4 sm:$0xff]   ;;  %v3039_v41 = vld [vmem:[#allocation5 + $0x488] ss:$16 sps:$4 sm:$0xff]  }
  0xb0   : > { %1640 = vmatpush1.bf16.msra.mxu0 %v2958_v43  ;;  %v3050_v43 = vld [vmem:[#allocation5 + $0x22c] ss:$16 sps:$4 sm:$0xff]  }
  0xb1   : > { %1718 = vmatpush1.bf16.msra.mxu1 %v2955_v42  ;;  %1641 = vmatprep.subr.bf16.mxu0 %v2966_v45  ;;  %v3047_v42 = vld [vmem:[#allocation5 + $0x46c] ss:$16 sps:$4 sm:$0xff]   ;;  %v3048_v45 = vld [vmem:[#allocation5 + $0x228] ss:$16 sps:$4 sm:$0xff]  }
  0xb2   : > { %1719 = vmatprep.subr.bf16.mxu1 %v2963_v44  ;;  %v3045_v44 = vld [vmem:[#allocation5 + $0x468] ss:$16 sps:$4 sm:$0xff]  }
  0xb4   : > { %1642 = vmatpush2.bf16.msra.mxu0 %v2964_v47  ;;  %v3051_v47 = vld [vmem:[#allocation5 + $0x448] ss:$16 sps:$4 sm:$0xff]  }
  0xb5   : > { %1720 = vmatpush1.bf16.msra.mxu1 %v2961_v46  ;;  %1643 = vmatprep.subr.bf16.mxu0 %v2972_v49  ;;  %v3056_v46 = vld [vmem:[#allocation5 + $0x20c] ss:$16 sps:$4 sm:$0xff]  }
  0xb6   : > { %1721 = vmatprep.subr.bf16.mxu1 %v2969_v48  ;;  %v3054_v48 = vld [vmem:[#allocation5 + $0x208] ss:$16 sps:$4 sm:$0xff]   ;;  %v3059_v49 = vld [vmem:[#allocation5 + $0x42c] ss:$16 sps:$4 sm:$0xff]  }
  0xb8   : > { %1644 = vmatpush2.bf16.msra.mxu0 %v2970_v51  ;;  %v3057_v51 = vld [vmem:[#allocation5 + $0x428] ss:$16 sps:$4 sm:$0xff]  }
  0xb9   : > { %1722 = vmatpush1.bf16.msra.mxu1 %v2967_v50  ;;  %1645 = vmatprep.subr.bf16.mxu0 %v2978_v54  ;;  %v3062_v50 = vld [vmem:[#allocation5 + $0x3ec] ss:$16 sps:$4 sm:$0xff]  }
  0xba   : > { %1723 = vmatprep.subr.bf16.mxu1 %v2975_v52  ;;  %v3060_v52 = vld [vmem:[#allocation5 + $0x3e8] ss:$16 sps:$4 sm:$0xff]   ;;  %v3065_v54 = vld [vmem:[#allocation5 + $0x40c] ss:$16 sps:$4 sm:$0xff]  }
  0xbc   : > { %1646 = vmatpush2.bf16.msra.mxu0 %v2976_v56  ;;  %v3063_v56 = vld [vmem:[#allocation5 + $0x408] ss:$16 sps:$4 sm:$0xff]  }
  0xbd   : > { %1724 = vmatpush2.bf16.msra.mxu1 %v2973_v55  ;;  %1647 = vmatprep.subr.bf16.mxu0 %v2984_v58  ;;  %v3068_v55 = vld [vmem:[#allocation5 + $0x3cc] ss:$16 sps:$4 sm:$0xff]  }
  0xbe   : > { %1725 = vmatprep.subr.bf16.mxu1 %v2981_v57  ;;  %v3066_v57 = vld [vmem:[#allocation5 + $0x3c8] ss:$16 sps:$4 sm:$0xff]   ;;  %v3071_v58 = vld [vmem:[#allocation5 + $0x5ec] ss:$16 sps:$4 sm:$0xff]  }
  0xc0   : > { %1648 = vmatpush2.bf16.msra.mxu0 %v2982_v60  ;;  %v3069_v60 = vld [vmem:[#allocation5 + $0x5e8] ss:$16 sps:$4 sm:$0xff]  }
  0xc1   : > { %1726 = vmatpush2.bf16.msra.mxu1 %v2979_v59  ;;  %1649 = vmatprep.subr.bf16.mxu0 %v2990_v62  ;;  %v3074_v59 = vld [vmem:[#allocation5 + $0x3ac] ss:$16 sps:$4 sm:$0xff]  }
  0xc2   : > { %1727 = vmatprep.subr.bf16.mxu1 %v2987_v61  ;;  %v3072_v61 = vld [vmem:[#allocation5 + $0x3a8] ss:$16 sps:$4 sm:$0xff]   ;;  %v3077_v62 = vld [vmem:[#allocation5 + $0x5cc] ss:$16 sps:$4 sm:$0xff]  }
  0xc4   : > { %1650 = vmatpush2.bf16.msra.mxu0 %v2988_v0  ;;  %v3075_v0 = vld [vmem:[#allocation5 + $0x5c8] ss:$16 sps:$4 sm:$0xff]  }
  0xc5   : > { %1728 = vmatpush2.bf16.msra.mxu1 %v2985_v63  ;;  %1651 = vmatprep.subr.bf16.mxu0 %v2996_v2  ;;  %v3080_v63 = vld [vmem:[#allocation5 + $0x38c] ss:$16 sps:$4 sm:$0xff]  }
  0xc6   : > { %1729 = vmatprep.subr.bf16.mxu1 %v2993_v1  ;;  %v3078_v1 = vld [vmem:[#allocation5 + $0x388] ss:$16 sps:$4 sm:$0xff]   ;;  %v3083_v2 = vld [vmem:[#allocation5 + $0x5ac] ss:$16 sps:$4 sm:$0xff]  }
  0xc8   : > { %1652 = vmatpush2.bf16.msra.mxu0 %v2994_v4  ;;  %v3081_v4 = vld [vmem:[#allocation5 + $0x5a8] ss:$16 sps:$4 sm:$0xff]  }
  0xc9   : > { %1730 = vmatpush2.bf16.msra.mxu1 %v2991_v3  ;;  %1653 = vmatprep.subr.bf16.mxu0 %v3002_v6  ;;  %v3086_v3 = vld [vmem:[#allocation5 + $0x36c] ss:$16 sps:$4 sm:$0xff]  }
  0xca   : > { %1731 = vmatprep.subr.bf16.mxu1 %v2999_v5  ;;  %v3084_v5 = vld [vmem:[#allocation5 + $0x368] ss:$16 sps:$4 sm:$0xff]   ;;  %v3089_v6 = vld [vmem:[#allocation5 + $0x58c] ss:$16 sps:$4 sm:$0xff]  }
  0xcc   : > { %1654 = vmatpush2.bf16.msra.mxu0 %v3000_v8  ;;  %v3087_v8 = vld [vmem:[#allocation5 + $0x588] ss:$16 sps:$4 sm:$0xff]  }
  0xcd   : > { %1732 = vmatpush2.bf16.msra.mxu1 %v2997_v7  ;;  %1655 = vmatprep.subr.bf16.mxu0 %v3008_v12  ;;  %v3092_v7 = vld [vmem:[#allocation5 + $0x34c] ss:$16 sps:$4 sm:$0xff]  }
  0xce   : > { %1733 = vmatprep.subr.bf16.mxu1 %v3005_v11  ;;  %v3090_v11 = vld [vmem:[#allocation5 + $0x348] ss:$16 sps:$4 sm:$0xff]   ;;  %v3095_v12 = vld [vmem:[#allocation5 + $0x56c] ss:$16 sps:$4 sm:$0xff]  }
  0xd0   : > { %1656 = vmatpush2.bf16.msra.mxu0 %v3006_v14  ;;  %v3093_v14 = vld [vmem:[#allocation5 + $0x568] ss:$16 sps:$4 sm:$0xff]  }
  0xd1   : > { %1734 = vmatpush2.bf16.msra.mxu1 %v3003_v13  ;;  %1748 = vmatprep.subr.bf16.mxu0 %v3014_v18  ;;  %v3098_v13 = vld [vmem:[#allocation5 + $0x32c] ss:$16 sps:$4 sm:$0xff]  }
  0xd2   : > { %1735 = vmatprep.subr.bf16.mxu1 %v3011_v15  ;;  %v3096_v15 = vld [vmem:[#allocation5 + $0x328] ss:$16 sps:$4 sm:$0xff]   ;;  %v3104_v18 = vld [vmem:[#allocation5 + $0x30c] ss:$16 sps:$4 sm:$0xff]  }
  0xd3   : > { %1658 = vmatmul.mubr.bf16.vlgmr.msra.gmra.mxu0 %v3525_v21 }
  0xd4   : > { %1749 = vmatpush1.bf16.msra.mxu0 %v3012_v22  ;;  %1780 = vmatprep.mubr.bf16.mxu0 %v3501_v53  ;;  %v3036_v53 = vld [vmem:[#allocation5 + $0x268] ss:$16 sps:$4 sm:$0xff]  }
  0xd5   : > { %1736 = vmatpush2.bf16.msra.mxu1 %v3009_v19  ;;  %1750 = vmatprep.subr.bf16.mxu0 %v3020_v24  ;;  %v3099_v19 = vld [vmem:[#allocation5 + $0x548] ss:$16 sps:$4 sm:$0xff]   ;;  %v3110_v24 = vld [vmem:[#allocation5 + $0x60c] ss:$16 sps:$4 sm:$0xff]  }
  0xd6   : > { %1737 = vmatprep.subr.bf16.mxu1 %v3017_v23  ;;  %v3102_v22 = vld [vmem:[#allocation5 + $0x308] ss:$16 sps:$4 sm:$0xff]   ;;  %v3107_v23 = vld [vmem:[#allocation5 + $0x52c] ss:$16 sps:$4 sm:$0xff]  }
  0xd8   : > { %1751 = vmatpush1.bf16.msra.mxu0 %v3018_v26  ;;  %v3108_v26 = vld [vmem:[#allocation5 + $0x608] ss:$16 sps:$4 sm:$0xff]  }
  0xd9   : > { %1738 = vmatpush2.bf16.msra.mxu1 %v3015_v25  ;;  %1752 = vmatprep.subr.bf16.mxu0 %v3026_v28  ;;  %v3105_v25 = vld [vmem:[#allocation5 + $0x528] ss:$16 sps:$4 sm:$0xff]   ;;  %v3116_v28 = vld [vmem:[#allocation7 + $0x74] ss:$8 sps:$4 sm:$0xff]  }
  0xda   : > { %1789 = vmatprep.subr.bf16.mxu1 %v3023_v27  ;;  %v3113_v27 = vld [vmem:[#allocation5 + $0x50c] ss:$16 sps:$4 sm:$0xff]  }
  0xdc   : > { %1740 = vmatmul.mubr.bf16.vlgmr.msra.gmra.mxu1 %v3507_v9  ;;  %1753 = vmatpush1.bf16.msra.mxu0 %v3024_v30  ;;  %v3042_v9 = vld [vmem:[#allocation5 + $0x248] ss:$16 sps:$4 sm:$0xff]  }
  0xdd   : > { %1790 = vmatpush1.bf16.msra.mxu1 %v3021_v29  ;;  %1754 = vmatprep.subr.bf16.mxu0 %v3032_v32  ;;  %v3111_v29 = vld [vmem:[#allocation5 + $0x508] ss:$16 sps:$4 sm:$0xff]  }
  0xde   : > { %1791 = vmatprep.subr.bf16.mxu1 %v3029_v31  ;;  %1821 = vmatprep.mubr.bf16.mxu1 %v3521_v37  ;;  %v3053_v37 = vld [vmem:[#allocation5 + $0x44c] ss:$16 sps:$4 sm:$0xff]   ;;  %v3114_v30 = vld [vmem:[#allocation7 + $0x70] ss:$8 sps:$4 sm:$0xff]   ;;  %v3117_v32 = vld [vmem:[#allocation7 + $0x60] ss:$8 sps:$4 sm:$0xff]  }
  0xdf   : > { %v3119_v31 = vld [vmem:[#allocation7 + $0x64] ss:$8 sps:$4 sm:$0xff]  }
  0xe0   : > { %1755 = vmatpush1.bf16.msra.mxu0 %v3030_v34  ;;  %v3125_v34 = vld [vmem:[#allocation7 + $0x44] ss:$8 sps:$4 sm:$0xff]  }
  0xe1   : > { %1792 = vmatpush1.bf16.msra.mxu1 %v3027_v33  ;;  %1756 = vmatprep.subr.bf16.mxu0 %v3038_v36  ;;  %v3122_v33 = vld [vmem:[#allocation7 + $0x54] ss:$8 sps:$4 sm:$0xff]  }
  0xe2   : > { %1793 = vmatprep.subr.bf16.mxu1 %v3035_v35  ;;  %v3162_v35 = vld [vmem:[#allocation7 + $0x170] ss:$8 sps:$4 sm:$0xff]   ;;  %v3164_v36 = vld [vmem:[#allocation7 + $0x174] ss:$8 sps:$4 sm:$0xff]  }
  0xe4   : > { %1757 = vmatpush1.bf16.msra.mxu0 %v3036_v53  ;;  %v3165_v53 = vld [vmem:[#allocation7 + $0x160] ss:$8 sps:$4 sm:$0xff]  }
  0xe5   : > { %1794 = vmatpush1.bf16.msra.mxu1 %v3033_v38  ;;  %1758 = vmatprep.subr.bf16.mxu0 %v3044_v40  ;;  %v3123_v38 = vld [vmem:[#allocation7 + $0x40] ss:$8 sps:$4 sm:$0xff]   ;;  %v3168_v40 = vld [vmem:[#allocation7 + $0x150] ss:$8 sps:$4 sm:$0xff]  }
  0xe6   : > { %1795 = vmatprep.subr.bf16.mxu1 %v3041_v39  ;;  %v3126_v39 = vld [vmem:[#allocation7 + $0x30] ss:$8 sps:$4 sm:$0xff]  }
  0xe8   : > { %1759 = vmatpush1.bf16.msra.mxu0 %v3042_v9  ;;  %v3173_v9 = vld [vmem:[#allocation7 + $0x144] ss:$8 sps:$4 sm:$0xff]  }
  0xe9   : > { %1796 = vmatpush1.bf16.msra.mxu1 %v3039_v41  ;;  %1760 = vmatprep.subr.bf16.mxu0 %v3050_v43  ;;  %v3131_v41 = vld [vmem:[#allocation7 + $0x24] ss:$8 sps:$4 sm:$0xff]   ;;  %v3171_v43 = vld [vmem:[#allocation7 + $0x140] ss:$8 sps:$4 sm:$0xff]  }
  0xea   : > { %1797 = vmatprep.subr.bf16.mxu1 %v3047_v42  ;;  %v3129_v42 = vld [vmem:[#allocation7 + $0x20] ss:$8 sps:$4 sm:$0xff]  }
  0xec   : > { %1761 = vmatpush1.bf16.msra.mxu0 %v3048_v45  ;;  %v3176_v45 = vld [vmem:[#allocation7 + $0x134] ss:$8 sps:$4 sm:$0xff]  }
  0xed   : > { %1798 = vmatpush1.bf16.msra.mxu1 %v3045_v44  ;;  %1762 = vmatprep.subr.bf16.mxu0 %v3056_v46  ;;  %v3134_v44 = vld [vmem:[#allocation7 + $0x14] ss:$8 sps:$4 sm:$0xff]   ;;  %v3174_v46 = vld [vmem:[#allocation7 + $0x130] ss:$8 sps:$4 sm:$0xff]  }
  0xee   : > { %1799 = vmatprep.subr.bf16.mxu1 %v3053_v37  ;;  %v3132_v37 = vld [vmem:[#allocation7 + $0x10] ss:$8 sps:$4 sm:$0xff]  }
  0xf0   : > { %1763 = vmatpush1.bf16.msra.mxu0 %v3054_v48  ;;  %v3179_v48 = vld [vmem:[#allocation7 + $0x124] ss:$8 sps:$4 sm:$0xff]  }
  0xf1   : > { %1800 = vmatpush1.bf16.msra.mxu1 %v3051_v47  ;;  %1764 = vmatprep.subr.bf16.mxu0 %v3062_v50  ;;  %v3137_v47 = vld [vmem:[#allocation7 + $0x4] ss:$8 sps:$4 sm:$0xff]   ;;  %v3177_v50 = vld [vmem:[#allocation7 + $0x120] ss:$8 sps:$4 sm:$0xff]  }
  0xf2   : > { %1801 = vmatprep.subr.bf16.mxu1 %v3059_v49  ;;  %v3135_v49 = vld [vmem:[#allocation7] ss:$8 sps:$4 sm:$0xff]  }
  0xf4   : > { %1765 = vmatpush2.bf16.msra.mxu0 %v3060_v52  ;;  %v3182_v52 = vld [vmem:[#allocation7 + $0x114] ss:$8 sps:$4 sm:$0xff]  }
  0xf5   : > { %1802 = vmatpush1.bf16.msra.mxu1 %v3057_v51  ;;  %1766 = vmatprep.subr.bf16.mxu0 %v3068_v55  ;;  %v3140_v51 = vld [vmem:[#allocation7 + $0xf4] ss:$8 sps:$4 sm:$0xff]   ;;  %v3180_v55 = vld [vmem:[#allocation7 + $0x110] ss:$8 sps:$4 sm:$0xff]  }
  0xf6   : > { %1803 = vmatprep.subr.bf16.mxu1 %v3065_v54  ;;  %v3138_v54 = vld [vmem:[#allocation7 + $0xf0] ss:$8 sps:$4 sm:$0xff]  }
  0xf8   : > { %1767 = vmatpush2.bf16.msra.mxu0 %v3066_v57  ;;  %v3185_v57 = vld [vmem:[#allocation7 + $0x104] ss:$8 sps:$4 sm:$0xff]  }
  0xf9   : > { %1804 = vmatpush1.bf16.msra.mxu1 %v3063_v56  ;;  %1768 = vmatprep.subr.bf16.mxu0 %v3074_v59  ;;  %v3143_v56 = vld [vmem:[#allocation7 + $0xe4] ss:$8 sps:$4 sm:$0xff]   ;;  %v3183_v59 = vld [vmem:[#allocation7 + $0x100] ss:$8 sps:$4 sm:$0xff]  }
  0xfa   : > { %1805 = vmatprep.subr.bf16.mxu1 %v3071_v58  ;;  %v3141_v58 = vld [vmem:[#allocation7 + $0xe0] ss:$8 sps:$4 sm:$0xff]  }
  0xfc   : > { %1769 = vmatpush2.bf16.msra.mxu0 %v3072_v61  ;;  %v3188_v61 = vld [vmem:[#allocation7 + $0x1f4] ss:$8 sps:$4 sm:$0xff]  }
  0xfd   : > { %1806 = vmatpush2.bf16.msra.mxu1 %v3069_v60  ;;  %1770 = vmatprep.subr.bf16.mxu0 %v3080_v63  ;;  %v3146_v60 = vld [vmem:[#allocation7 + $0xd4] ss:$8 sps:$4 sm:$0xff]   ;;  %v3186_v63 = vld [vmem:[#allocation7 + $0x1f0] ss:$8 sps:$4 sm:$0xff]  }
  0xfe   : > { %1807 = vmatprep.subr.bf16.mxu1 %v3077_v62  ;;  %v3144_v62 = vld [vmem:[#allocation7 + $0xd0] ss:$8 sps:$4 sm:$0xff]  }
 0x100   : > { %1771 = vmatpush2.bf16.msra.mxu0 %v3078_v1  ;;  %v3191_v1 = vld [vmem:[#allocation7 + $0x1e4] ss:$8 sps:$4 sm:$0xff]  }
 0x101   : > { %1808 = vmatpush2.bf16.msra.mxu1 %v3075_v0  ;;  %1772 = vmatprep.subr.bf16.mxu0 %v3086_v3  ;;  %v3149_v0 = vld [vmem:[#allocation7 + $0xc4] ss:$8 sps:$4 sm:$0xff]   ;;  %v3189_v3 = vld [vmem:[#allocation7 + $0x1e0] ss:$8 sps:$4 sm:$0xff]  }
 0x102   : > { %1809 = vmatprep.subr.bf16.mxu1 %v3083_v2  ;;  %v3147_v2 = vld [vmem:[#allocation7 + $0xc0] ss:$8 sps:$4 sm:$0xff]  }
 0x104   : > { %1773 = vmatpush2.bf16.msra.mxu0 %v3084_v5  ;;  %v3194_v5 = vld [vmem:[#allocation7 + $0x1d4] ss:$8 sps:$4 sm:$0xff]  }
 0x105   : > { %1810 = vmatpush2.bf16.msra.mxu1 %v3081_v4  ;;  %1774 = vmatprep.subr.bf16.mxu0 %v3092_v7  ;;  %v3152_v4 = vld [vmem:[#allocation7 + $0xb4] ss:$8 sps:$4 sm:$0xff]   ;;  %v3192_v7 = vld [vmem:[#allocation7 + $0x1d0] ss:$8 sps:$4 sm:$0xff]  }
 0x106   : > { %1811 = vmatprep.subr.bf16.mxu1 %v3089_v6  ;;  %v3150_v6 = vld [vmem:[#allocation7 + $0xb0] ss:$8 sps:$4 sm:$0xff]  }
 0x108   : > { %1775 = vmatpush2.bf16.msra.mxu0 %v3090_v11  ;;  %v3197_v11 = vld [vmem:[#allocation7 + $0x1c4] ss:$8 sps:$4 sm:$0xff]  }
 0x109   : > { %1812 = vmatpush2.bf16.msra.mxu1 %v3087_v8  ;;  %1776 = vmatprep.subr.bf16.mxu0 %v3098_v13  ;;  %v3155_v8 = vld [vmem:[#allocation7 + $0xa4] ss:$8 sps:$4 sm:$0xff]   ;;  %v3195_v13 = vld [vmem:[#allocation7 + $0x1c0] ss:$8 sps:$4 sm:$0xff]  }
 0x10a   : > { %1813 = vmatprep.subr.bf16.mxu1 %v3095_v12  ;;  %v3153_v12 = vld [vmem:[#allocation7 + $0xa0] ss:$8 sps:$4 sm:$0xff]  }
 0x10c   : > { %1777 = vmatpush2.bf16.msra.mxu0 %v3096_v15  ;;  %v3156_v15 = vld [vmem:[#allocation7 + $0x90] ss:$8 sps:$4 sm:$0xff]  }
 0x10d   : > { %1814 = vmatpush2.bf16.msra.mxu1 %v3093_v14  ;;  %1778 = vmatprep.subr.bf16.mxu0 %v3104_v18  ;;  %v3158_v14 = vld [vmem:[#allocation7 + $0x94] ss:$8 sps:$4 sm:$0xff]  }
 0x10e   : > { %1815 = vmatprep.subr.bf16.mxu1 %v3101_v16  ;;  %v3161_v16 = vld [vmem:[#allocation7 + $0x84] ss:$8 sps:$4 sm:$0xff]  }
 0x110   : > { %1779 = vmatpush2.bf16.msra.mxu0 %v3102_v22  ;;  %v3159_v22 = vld [vmem:[#allocation7 + $0x80] ss:$8 sps:$4 sm:$0xff]  }
 0x111   : > { %1816 = vmatpush2.bf16.msra.mxu1 %v3099_v19  ;;  %1844 = vmatprep.subr.bf16.mxu0 %v3110_v24 }
 0x112   : > { %1817 = vmatprep.subr.bf16.mxu1 %v3107_v23 }
 0x113   : > { %1781 = vmatmul.mubr.bf16.vlgmr.msra.gmra.mxu0 %v3509_v10  ;;  %v3120_v10 = vld [vmem:[#allocation7 + $0x50] ss:$8 sps:$4 sm:$0xff]  }
 0x114   : > { %1845 = vmatpush1.bf16.msra.mxu0 %v3108_v26  ;;  %1862 = vmatprep.mubr.bf16.mxu0 %v3341_v17  ;;  %v3167_v17 = vld [vmem:[#allocation7 + $0x164] ss:$8 sps:$4 sm:$0xff]   ;;  %v3198_v26 = vld [vmem:[#allocation7 + $0x1b0] ss:$8 sps:$4 sm:$0xff]  }
 0x115   : > { %1818 = vmatpush2.bf16.msra.mxu1 %v3105_v25  ;;  %2275 = vmatprep.subr.bf16.mxu0 %v3116_v28  ;;  %v3200_v25 = vld [vmem:[#allocation7 + $0x1b4] ss:$8 sps:$4 sm:$0xff]  }
 0x116   : > { %1819 = vmatprep.subr.bf16.mxu1 %v3113_v27 }
 0x119   : > { %1820 = vmatpush2.bf16.msra.mxu1 %v3111_v29 }
 0x11a   : > { %2316 = vmatprep.subr.bf16.mxu1 %v3164_v36 }
 0x11b   : > { %2683 = vmatmul.mubr.msk.bf16.vlgmr.msra.gmra.mxu0 %vm1539_vm0, %v3515_v20  ;;  %v3170_v20 = vld [vmem:[#allocation7 + $0x154] ss:$8 sps:$4 sm:$0xff]  }
 0x11c   : > { %1822 = vmatmul.mubr.bf16.vlgmr.msra.gmra.mxu1 %v3525_v21  ;;  %2276 = vmatpush1.bf16.msra.mxu0 %v3114_v30  ;;  %v3128_v21 = vld [vmem:[#allocation7 + $0x34] ss:$8 sps:$4 sm:$0xff]  }
 0x11d   : > { %2277 = vmatprep.subr.bf16.mxu0 %v3119_v31  ;;  %2317 = vmatpush1.bf16.msra.mxu1 %v3162_v35  ;;  %v3203_v31 = vld [vmem:[#allocation7 + $0x1a4] ss:$8 sps:$4 sm:$0xff]   ;;  %v3204_v35 = vld [vmem:[#allocation7 + $0x190] ss:$8 sps:$4 sm:$0xff]  }
 0x11e   : > { %2318 = vmatprep.subr.bf16.mxu1 %v3167_v17 }
 0x120   : > { %2278 = vmatpush1.bf16.msra.mxu0 %v3117_v32  ;;  %v3201_v32 = vld [vmem:[#allocation7 + $0x1a0] ss:$8 sps:$4 sm:$0xff]  }
 0x121   : > { %2279 = vmatprep.subr.bf16.mxu0 %v3122_v33  ;;  %2319 = vmatpush1.bf16.msra.mxu1 %v3165_v53  ;;  %v3207_v53 = vld [vmem:[#allocation7 + $0x180] ss:$8 sps:$4 sm:$0xff]  }
 0x122   : > { %2320 = vmatprep.subr.bf16.mxu1 %v3170_v20 }
 0x124   : > { %2280 = vmatpush1.bf16.msra.mxu0 %v3120_v10 }
 0x125   : > { %2281 = vmatprep.subr.bf16.mxu0 %v3125_v34  ;;  %2321 = vmatpush1.bf16.msra.mxu1 %v3168_v40  ;;  %v3206_v34 = vld [vmem:[#allocation7 + $0x194] ss:$8 sps:$4 sm:$0xff]   ;;  %v537_v40 = vld [vmem:[%s3575_s2] sm:$0xf] }
 0x126   : > { %2322 = vmatprep.subr.bf16.mxu1 %v3173_v9 }
 0x128   : > { %2282 = vmatpush1.bf16.msra.mxu0 %v3123_v38  ;;  %v3209_v38 = vld [vmem:[#allocation7 + $0x184] ss:$8 sps:$4 sm:$0xff]  }
 0x129   : > { %2283 = vmatprep.subr.bf16.mxu0 %v3128_v21  ;;  %2323 = vmatpush1.bf16.msra.mxu1 %v3171_v43  ;;  %v539_v21 = vlaneseq }
 0x12a   : > { %2324 = vmatprep.subr.bf16.mxu1 %v3176_v45 }
 0x12b   : > { %v540_v20 = vshrl.u32 %v539_v21, 7  ;;  %v2359_v21 = vld [vmem:[%s3578_s5] sm:$0x3] }
 0x12c   : > { %2284 = vmatpush1.bf16.msra.mxu0 %v3126_v39 }
 0x12d   : > { %2285 = vmatprep.subr.bf16.mxu0 %v3131_v41  ;;  %2325 = vmatpush1.bf16.msra.mxu1 %v3174_v46  ;;  %v3536_v39 = vsub.s32 0, %v540_v20  ;;  %v3541_v41 = vsub.s32 1, %v540_v20 }
 0x12e   : > { %2326 = vmatprep.subr.bf16.mxu1 %v3179_v48 }
 0x12f   : > { %v542_v9 = vrot.slane %v537_v40, %v3536_v39 }
 0x130   : > { %2286 = vmatpush1.bf16.msra.mxu0 %v3129_v42  ;;  %v546_v42 = vrot.slane %v537_v40, %v3541_v41 }
 0x131   : > { %2287 = vmatprep.subr.bf16.mxu0 %v3134_v44  ;;  %2327 = vmatpush1.bf16.msra.mxu1 %v3177_v50 }
 0x132   : > { %2328 = vmatprep.subr.bf16.mxu1 %v3182_v52 }
 0x134   : > { %2288 = vmatpush1.bf16.msra.mxu0 %v3132_v37 }
 0x135   : > { %2289 = vmatprep.subr.bf16.mxu0 %v3137_v47  ;;  %2329 = vmatpush1.bf16.msra.mxu1 %v3180_v55 }
 0x136   : > { %2330 = vmatprep.subr.bf16.mxu1 %v3185_v57 }
 0x138   : > { %2290 = vmatpush1.bf16.msra.mxu0 %v3135_v49 }
 0x139   : > { %2291 = vmatprep.subr.bf16.mxu0 %v3140_v51  ;;  %2331 = vmatpush1.bf16.msra.mxu1 %v3183_v59 }
 0x13a   : > { %2332 = vmatprep.subr.bf16.mxu1 %v3188_v61 }
 0x13c   : > { %2292 = vmatpush2.bf16.msra.mxu0 %v3138_v54 }
 0x13d   : > { %2293 = vmatprep.subr.bf16.mxu0 %v3143_v56  ;;  %2333 = vmatpush2.bf16.msra.mxu1 %v3186_v63  ;;  %v549_v63 = vsub.s32 2, %v540_v20 }
 0x13e   : > { %2334 = vmatprep.subr.bf16.mxu1 %v3191_v1 }
 0x140   : > { %2294 = vmatpush2.bf16.msra.mxu0 %v3141_v58 }
 0x141   : > { %2295 = vmatprep.subr.bf16.mxu0 %v3146_v60  ;;  %2335 = vmatpush2.bf16.msra.mxu1 %v3189_v3 }
 0x142   : > { %2336 = vmatprep.subr.bf16.mxu1 %v3194_v5 }
 0x144   : > { %2296 = vmatpush2.bf16.msra.mxu0 %v3144_v62 }
 0x145   : > { %2297 = vmatprep.subr.bf16.mxu0 %v3149_v0  ;;  %2337 = vmatpush2.bf16.msra.mxu1 %v3192_v7  ;;  %v553_v0 = vsub.s32 3, %v540_v20 }
 0x146   : > { %2338 = vmatprep.subr.bf16.mxu1 %v3197_v11 }
 0x148   : > { %2298 = vmatpush2.bf16.msra.mxu0 %v3147_v2  ;;  %v550_v2 = vrot.slane %v537_v40, %v549_v63 }
 0x149   : > { %2299 = vmatprep.subr.bf16.mxu0 %v3152_v4  ;;  %2339 = vmatpush2.bf16.msra.mxu1 %v3195_v13  ;;  %v554_v4 = vrot.slane %v537_v40, %v553_v0 }
 0x14a   : > { %2340 = vmatprep.subr.bf16.mxu1 %v3200_v25 }
 0x14c   : > { %2300 = vmatpush2.bf16.msra.mxu0 %v3150_v6 }
 0x14d   : > { %2301 = vmatprep.subr.bf16.mxu0 %v3155_v8  ;;  %2341 = vmatpush2.bf16.msra.mxu1 %v3198_v26 }
 0x14e   : > { %2342 = vmatprep.subr.bf16.mxu1 %v3203_v31 }
 0x150   : > { %2302 = vmatpush2.bf16.msra.mxu0 %v3153_v12 }
 0x151   : > { %2303 = vmatprep.subr.bf16.mxu0 %v3158_v14  ;;  %2343 = vmatpush2.bf16.msra.mxu1 %v3201_v32 }
 0x152   : > { %2344 = vmatprep.subr.bf16.mxu1 %v3206_v34 }
 0x153   : > { %v1577_v18 = vpop.f32.mrf.mxu0 }
 0x154   : > { %v1618_v19 = vpop.f32.mrf.mxu1  ;;  %2304 = vmatpush2.bf16.msra.mxu0 %v3156_v15  ;;  %v1578_v43 = vadd.f32 %v1577_v18, %v542_v9 }
 0x155   : > { %v1579_v23 = vpop.f32.mrf.mxu0  ;;  %2305 = vmatprep.subr.bf16.mxu0 %v3161_v16  ;;  %2345 = vmatpush2.bf16.msra.mxu1 %v3204_v35  ;;  %v1943_v35 = vld [vmem:[%s3577_s4] sm:$0x3] }
 0x156   : > { %v1620_v24 = vpop.f32.mrf.mxu1  ;;  %2346 = vmatprep.subr.bf16.mxu1 %v3209_v38  ;;  %v1580_v44 = vadd.f32 %v1579_v23, %v546_v42  ;;  %v1619_v45 = vadd.f32 %v1618_v19, %v1578_v43 }
 0x157   : > { %v1581_v27 = vpop.f32.mrf.mxu0 }
 0x158   : > { %v1622_v28 = vpop.f32.mrf.mxu1  ;;  %2306 = vmatpush2.bf16.msra.mxu0 %v3159_v22  ;;  %v1621_v46 = vadd.f32 %v1620_v24, %v1580_v44  ;;  %v2364_v44 = vrot.slane %v2359_v21, %v3536_v39 }
 0x159   : > { %v1582_v29 = vpop.f32.mrf.mxu0  ;;  %2347 = vmatpush2.bf16.msra.mxu1 %v3207_v53 }
 0x15a   : > { %v1623_v30 = vpop.f32.mrf.mxu1 }
 0x15c   : > { %v1700_v33 = vpop.f32.mrf.mxu1 }
 0x15e   : > { %v1702_v10 = vpop.f32.mrf.mxu1 }
 0x160   : > { %v1704_v36 = vpop.f32.mrf.mxu1 }
 0x161   : > { %v1948_v36 = vrot.slane %v1943_v35, %v3536_v39 }
 0x162   : > { %v1705_v17 = vpop.f32.mrf.mxu1 }
 0x163   : > { %v1952_v17 = vrot.slane %v1943_v35, %v3541_v41 }
 0x193   : > { %v1659_v37 = vpop.f32.mrf.mxu0 }
 0x194   : > { %v1660_v47 = vadd.f32 %v1659_v37, %v1619_v45  ;;  %v2368_v45 = vrot.slane %v2359_v21, %v3541_v41 }
 0x195   : > { %v1661_v48 = vpop.f32.mrf.mxu0 }
 0x196   : > { %v1701_v49 = vadd.f32 %v1700_v33, %v1660_v47  ;;  %v1662_v50 = vadd.f32 %v1661_v48, %v1621_v46 }
 0x197   : > { %v1663_v51 = vpop.f32.mrf.mxu0 }
 0x198   : > { %v1703_v52 = vadd.f32 %v1702_v10, %v1662_v50  ;;  %v1871_v54 = vmax.f32 %v1701_v49, 0.0  ;;  %v2748_v51 = vld [vmem:[#allocation2] ss:$0 sm:$0xff] }
 0x199   : > { %v1664_v55 = vpop.f32.mrf.mxu0 }
 0x19a   : > { %v1872_v56 = vmax.f32 %v1703_v52, 0.0  ;;  %v1875_v59 = vpack.c.bf16 %v1871_v54, %v1871_v54 }
 0x19c   : > { %v1741_v57 = vpop.f32.mrf.mxu1  ;;  %v1876_v58 = vpack.c.bf16 %v1872_v56, %v1872_v56 }
 0x19d   : > { %v1742_v6 = vadd.f32 %v1741_v57, %v550_v2 }
 0x19e   : > { %v1743_v60 = vpop.f32.mrf.mxu1  ;;  %2307 = vmatprep.mubr.bf16.mxu0 %v1876_v58 }
 0x19f   : > { %2308 = vmatmul.mubr.bf16.vlgmr.msra.gmra.mxu0 %v1875_v59  ;;  %v1744_v8 = vadd.f32 %v1743_v60, %v554_v4 }
 0x1a0   : > { %v1745_v61 = vpop.f32.mrf.mxu1 }
 0x1a2   : > { %v1746_v62 = vpop.f32.mrf.mxu1 }
 0x1d3   : > { %v1782_v1 = vpop.f32.mrf.mxu0 }
 0x1d4   : > { %v1783_v11 = vadd.f32 %v1782_v1, %v1742_v6 }
 0x1d5   : > { %v1784_v3 = vpop.f32.mrf.mxu0 }
 0x1d6   : > { %v1785_v14 = vadd.f32 %v1784_v3, %v1744_v8 }
 0x1d7   : > { %v1786_v5 = vpop.f32.mrf.mxu0 }
 0x1d9   : > { %v1787_v7 = vpop.f32.mrf.mxu0 }
 0x1db   : > { %v1864_v13 = vpop.f32.mrf.mxu0 }
 0x1dc   : > { %v1823_v12 = vpop.f32.mrf.mxu1 }
 0x1dd   : > { %v1824_v15 = vadd.f32 %v1823_v12, %v1783_v11  ;;  %v1866_v18 = vpop.f32.mrf.mxu0 }
 0x1de   : > { %v1825_v16 = vpop.f32.mrf.mxu1 }
 0x1df   : > { %v1865_v19 = vadd.f32 %v1864_v13, %v1824_v15  ;;  %v1826_v22 = vadd.f32 %v1825_v16, %v1785_v14  ;;  %v1868_v24 = vpop.f32.mrf.mxu0 }
 0x1e0   : > { %v1827_v23 = vpop.f32.mrf.mxu1 }
 0x1e1   : > { %v1867_v25 = vadd.f32 %v1866_v18, %v1826_v22  ;;  %v1873_v26 = vmax.f32 %v1865_v19, 0.0  ;;  %v1869_v28 = vpop.f32.mrf.mxu0 }
 0x1e2   : > { %v1828_v27 = vpop.f32.mrf.mxu1 }
 0x1e3   : > { %v1874_v29 = vmax.f32 %v1867_v25, 0.0  ;;  %v1877_v31 = vpack.c.bf16 %v1873_v26, %v1873_v26 }
 0x1e5   : > { %v1878_v30 = vpack.c.bf16 %v1874_v29, %v1874_v29 }
 0x1e7   : > { %2348 = vmatprep.mubr.bf16.mxu1 %v1878_v30 }
 0x1e8   : > { %2349 = vmatmul.mubr.bf16.vlgmr.msra.gmra.mxu1 %v1877_v31 }
 0x25f   : > { %v2309_v32 = vpop.f32.mrf.mxu0 }
 0x260   : > { %v2310_v38 = vadd.f32 %v2309_v32, %v1948_v36 }
 0x261   : > { %v2311_v33 = vpop.f32.mrf.mxu0 }
 0x262   : > { %v2312_v20 = vadd.f32 %v2311_v33, %v1952_v17 }
 0x263   : > { %v2313_v10 = vpop.f32.mrf.mxu0 }
 0x265   : > { %v2314_v34 = vpop.f32.mrf.mxu0 }
 0x2a8   : > { %v2350_v53 = vpop.f32.mrf.mxu1 }
 0x2a9   : > { %v2351_v40 = vadd.f32 %v2350_v53, %v2310_v38 }
 0x2aa   : > { %v2352_v9 = vpop.f32.mrf.mxu1 }
 0x2ab   : > { %v2357_v42 = vmax.f32 %v2351_v40, 0.0  ;;  %v2353_v43 = vadd.f32 %v2352_v9, %v2312_v20 }
 0x2ac   : > { %v2354_v37 = vpop.f32.mrf.mxu1 }
 0x2ad   : > { %v2358_v46 = vmax.f32 %v2353_v43, 0.0  ;;  %v2371_v48 = vmul.f32 %v2364_v44, %v2357_v42 }
 0x2ae   : > { %v2355_v47 = vpop.f32.mrf.mxu1 }
 0x2af   : > { %v2372_v49 = vmul.f32 %v2368_v45, %v2358_v46 }
 0x2b1   : > { %v2373_v50 = vadd.f32 %v2372_v49, %v2371_v48 }
 0x2b3   : > { %2374 = vadd.xlane.f32.xlu0 %v2373_v50 }
 0x33c   : > { %v2375_v52 = vpop.xlane.xlu0 %2374 }
 0x33d   : > { %v2383_v54 = vadd.f32 %v2748_v51, %v2375_v52 }
 0x33f   : > { %v2749_v55 = vmul.f32 -1.442695, %v2383_v54 }
 0x341   : > { %3210 = vpow2.f32 %v2749_v55 }
 0x34e   : > { %v3211_v56 = vpop.eup %3210 }
 0x34f   : > { %v2387_v57 = vadd.f32 1.0, %v3211_v56 }
 0x351   : > { %3212 = vrcp.f32 %v2387_v57 }
 0x35e   : > { %v3213_v39 = vpop.eup %3212 }
 0x35f   : > { %2391 = vst.msk [vmem:[%s325_s23] sm:$0xff] %vm2390_vm1, %v3213_v39 }
 0x360 PF: > { %p20_p12 = scmp.ge.s32.totalorder %s3447_s24, 4   ;;  %s3592_s26 = smov %s3324_s27 }
 0x361   : > { %s3593_s27 = smov %s3328_s28  ;;  %s3594_s28 = smov %s3456_s9 }
 0x362   : > { %s3595_s29 = smov %s3447_s24  ;;  %22 = sbr.rel (!%p20_p12) target bundleno = 7 (0x7), region = 96 }
 0x367   :  { %2411 = vsyncpa [#allocation4], 1 }
 0x368   :  { %2413 = vsyncpa [#allocation4 + $0x1], 1 }
 0x369   :  { %2414 = vsyncpa [#allocation6], 1 }

</bundles_post_ra>
